<compile_context>
chip_gen: v5e
topology: v5e:2x2
jax: 0.10.0
libtpu: 0.0.40
codegen_flags: <defaults>
</compile_context>

<pallas_src>
import functools

import jax
import jax.numpy as jnp
from jax.experimental import pallas as pl
from jax.experimental.pallas import tpu as pltpu

_LANE = 128
_SUBLANE = 8


def _round_up(n, m):
    return ((n + m - 1) // m) * m


def _mlp_kernel(x_ref, w1_ref, w2_ref, w3_ref, o_ref, *, activation):
    """Fused 3-layer bias-free MLP on one batch tile; weights VMEM-resident."""
    if activation == "tanh":
        act = jnp.tanh                      # EUP slot
    else:
        act = lambda v: jnp.maximum(v, 0.0)  # VPU slot (ReLU)

    # Layer 1: bf16 operands on the MXU, f32 accumulate.
    h = jnp.dot(x_ref[...], w1_ref[...], preferred_element_type=jnp.float32)
    h = act(h).astype(w2_ref.dtype)
    # Layer 2.
    h = jnp.dot(h, w2_ref[...], preferred_element_type=jnp.float32)
    h = act(h).astype(w3_ref.dtype)
    # Output layer (output lanes padded to a multiple of 128 -> unmasked vst).
    out = jnp.dot(h, w3_ref[...], preferred_element_type=jnp.float32)
    o_ref[...] = out.astype(o_ref.dtype)


@functools.partial(
    jax.jit, static_argnames=("block_b", "compute_dtype", "activation")
)
def fully_connected_forward(
    x, w1, w2, w3, *, block_b=256, compute_dtype=jnp.bfloat16, activation="relu"
):
    """x: (B, obs_dim); w_i: (in_i, out_i) == torch Linear.weight.T.

    Returns (B, act_dim) in x.dtype. bf16 operands, f32 accumulation.
    """
    B, obs_dim = x.shape
    h1 = w1.shape[1]
    h2 = w2.shape[1]
    act_dim = w3.shape[1]
    assert w1.shape[0] == obs_dim and w2.shape[0] == h1 and w3.shape[0] == h2

    out_dtype = x.dtype
    act_pad = _round_up(act_dim, _LANE)  # lane-dense output width

    # ---- batch tile selection (static) -------------------------------------
    b8 = _round_up(B, _SUBLANE)
    bb = _round_up(min(block_b, b8), _SUBLANE)
    # Prefer >=2 grid steps so v7x's two TensorCores both get work.
    if b8 > _SUBLANE and pl.cdiv(b8, bb) < 2:
        bb = _round_up(pl.cdiv(b8, 2), _SUBLANE)
    b_pad = _round_up(B, bb)
    grid = (b_pad // bb,)

    # ---- operand preparation (cast to bf16, pad batch / output lanes) -------
    xc = x.astype(compute_dtype)
    if b_pad != B:
        xc = jnp.pad(xc, ((0, b_pad - B), (0, 0)))
    w1c = w1.astype(compute_dtype)
    w2c = w2.astype(compute_dtype)
    w3c = w3.astype(compute_dtype)
    if act_pad != act_dim:
        w3c = jnp.pad(w3c, ((0, 0), (0, act_pad - act_dim)))

    cbytes = jnp.dtype(compute_dtype).itemsize
    obytes = jnp.dtype(out_dtype).itemsize
    weight_elems = obs_dim * h1 + h1 * h2 + h2 * act_pad

    flops = 2 * b_pad * (obs_dim * h1 + h1 * h2 + h2 * act_pad)
    transcendentals = b_pad * (h1 + h2) if activation == "tanh" else 0
    bytes_accessed = (
        b_pad * obs_dim * cbytes          # activations in
        + weight_elems * cbytes           # weights in
        + b_pad * act_pad * obytes        # output
    )

    # VMEM budget: x tile + out tile (double-buffered) + resident weights
    # (double-buffered by the default pipeline), with generous headroom.
    vmem_needed = 4 * (
        2 * bb * obs_dim * cbytes
        + 2 * bb * act_pad * obytes
        + 2 * weight_elems * cbytes
    )
    vmem_limit = max(32 * 1024 * 1024, min(vmem_needed, 64 * 1024 * 1024))

    out_padded = pl.pallas_call(
        functools.partial(_mlp_kernel, activation=activation),
        out_shape=jax.ShapeDtypeStruct((b_pad, act_pad), out_dtype),
        grid_spec=pltpu.PrefetchScalarGridSpec(
            num_scalar_prefetch=0,
            grid=grid,
            in_specs=[
                # batch-tiled activations
                pl.BlockSpec((bb, obs_dim), lambda i: (i, 0)),
                # weights: full arrays, VMEM-resident across all grid steps
                pl.BlockSpec((obs_dim, h1), lambda i: (0, 0)),
                pl.BlockSpec((h1, h2), lambda i: (0, 0)),
                pl.BlockSpec((h2, act_pad), lambda i: (0, 0)),
            ],
            out_specs=pl.BlockSpec((bb, act_pad), lambda i: (i, 0)),
        ),
        compiler_params=pltpu.CompilerParams(
            dimension_semantics=("parallel",),
            vmem_limit_bytes=vmem_limit,
        ),
        cost_estimate=pl.CostEstimate(
            flops=flops,
            transcendentals=transcendentals,
            bytes_accessed=bytes_accessed,
        ),
    )(xc, w1c, w2c, w3c)

    return out_padded[:B, :act_dim]


def _init_linear_weight(key, fan_in, fan_out, dtype=jnp.float32):
    """Kaiming-uniform-like init (matches nn.Linear default bound), stored (in, out)."""
    bound = 1.0 / jnp.sqrt(fan_in)
    return jax.random.uniform(key, (fan_in, fan_out), dtype, -bound, bound)


def _reference(x, w1, w2, w3, compute_dtype=jnp.bfloat16, activation="relu"):
    """Pure-JAX reference matching the kernel's bf16-operand / f32-accum math."""
    act = jnp.tanh if activation == "tanh" else lambda v: jnp.maximum(v, 0.0)
    cd = compute_dtype
    h = jnp.dot(x.astype(cd), w1.astype(cd), preferred_element_type=jnp.float32)
    h = act(h)
    h = jnp.dot(h.astype(cd), w2.astype(cd), preferred_element_type=jnp.float32)
    h = act(h)
    out = jnp.dot(h.astype(cd), w3.astype(cd), preferred_element_type=jnp.float32)
    return out.astype(x.dtype)


if __name__ == "__main__":
    obs_dim, act_dim = 16, 4
    hidden_sizes = (32, 32)

    root = jax.random.PRNGKey(0)
    kx, k1, k2, k3, kx2 = jax.random.split(root, 5)

    w1 = _init_linear_weight(k1, obs_dim, hidden_sizes[0])
    w2 = _init_linear_weight(k2, hidden_sizes[0], hidden_sizes[1])
    w3 = _init_linear_weight(k3, hidden_sizes[1], act_dim)

    # Case 1: tiny batch consistent with the module (single grid step).
    x_small = jax.random.normal(kx, (8, obs_dim), dtype=jnp.float32)
    out_small = fully_connected_forward(x_small, w1, w2, w3)
    jax.block_until_ready(out_small)
    ref_small = _reference(x_small, w1, w2, w3)
    assert out_small.shape == (8, act_dim)
    assert jnp.allclose(out_small, ref_small, atol=5e-3, rtol=5e-3)

    # Case 2: larger, ragged batch -> multi-step parallel grid + padded
    # remainder tile (exercises the batch-padding path).
    x_big = jax.random.normal(kx2, (300, obs_dim), dtype=jnp.float32)
    out_big = fully_connected_forward(x_big, w1, w2, w3, block_b=128)
    jax.block_until_ready(out_big)
    ref_big = _reference(x_big, w1, w2, w3)
    assert out_big.shape == (300, act_dim)
    assert jnp.allclose(out_big, ref_big, atol=5e-3, rtol=5e-3)

    print("KERNEL_OK")
</pallas_src>

<mosaic_0001>
module attributes {stable_mosaic.version = 11 : i64} {
  func.func @_mlp_kernel(%arg0: i32, %arg1: memref<8x16xbf16, #tpu.memory_space<vmem>>, %arg2: memref<16x32xbf16, #tpu.memory_space<vmem>>, %arg3: memref<32x32xbf16, #tpu.memory_space<vmem>>, %arg4: memref<32x128xbf16, #tpu.memory_space<vmem>>, %arg5: memref<8x128xf32, #tpu.memory_space<vmem>>) attributes {dimension_semantics = [#tpu.dimension_semantics<parallel>], iteration_bounds = array<i64: 1>, scalar_prefetch = 0 : i64, scratch_operands = 0 : i64, tpu.core_type = #tpu.core_type<tc>, window_params = [{transform_indices = @transform_0, window_bounds = array<i64: 8, 16>}, {pipeline_mode = #tpu.pipeline_mode<synchronous>, transform_indices = @transform_1, window_bounds = array<i64: 16, 32>}, {pipeline_mode = #tpu.pipeline_mode<synchronous>, transform_indices = @transform_2, window_bounds = array<i64: 32, 32>}, {pipeline_mode = #tpu.pipeline_mode<synchronous>, transform_indices = @transform_3, window_bounds = array<i64: 32, 128>}, {transform_indices = @transform_4, window_bounds = array<i64: 8, 128>}]} {
    %c0 = arith.constant 0 : index
    %c0_0 = arith.constant 0 : index
    %0 = vector.load %arg1[%c0, %c0_0] : memref<8x16xbf16, #tpu.memory_space<vmem>>, vector<8x16xbf16>
    %c0_1 = arith.constant 0 : index
    %c0_2 = arith.constant 0 : index
    %1 = vector.load %arg2[%c0_1, %c0_2] : memref<16x32xbf16, #tpu.memory_space<vmem>>, vector<16x32xbf16>
    %cst = arith.constant dense<0.000000e+00> : vector<8x32xf32>
    %2 = tpu.matmul %0, %1, %cst {dimension_numbers = #tpu.dot_dimension_numbers<[1], [0], [0], [1], [0, 0, 1, 1], [], []>} : vector<8x16xbf16>, vector<16x32xbf16>, vector<8x32xf32> -> vector<8x32xf32>
    %cst_3 = arith.constant 0.000000e+00 : f32
    %3 = vector.broadcast %cst_3 : f32 to vector<8x32xf32>
    %4 = arith.maximumf %2, %3 : vector<8x32xf32>
    %5 = arith.truncf %4 : vector<8x32xf32> to vector<8x32xbf16>
    %c0_4 = arith.constant 0 : index
    %c0_5 = arith.constant 0 : index
    %6 = vector.load %arg3[%c0_4, %c0_5] : memref<32x32xbf16, #tpu.memory_space<vmem>>, vector<32x32xbf16>
    %cst_6 = arith.constant dense<0.000000e+00> : vector<8x32xf32>
    %7 = tpu.matmul %5, %6, %cst_6 {dimension_numbers = #tpu.dot_dimension_numbers<[1], [0], [0], [1], [0, 0, 1, 1], [], []>} : vector<8x32xbf16>, vector<32x32xbf16>, vector<8x32xf32> -> vector<8x32xf32>
    %cst_7 = arith.constant 0.000000e+00 : f32
    %8 = vector.broadcast %cst_7 : f32 to vector<8x32xf32>
    %9 = arith.maximumf %7, %8 : vector<8x32xf32>
    %10 = arith.truncf %9 : vector<8x32xf32> to vector<8x32xbf16>
    %c0_8 = arith.constant 0 : index
    %c0_9 = arith.constant 0 : index
    %11 = vector.load %arg4[%c0_8, %c0_9] : memref<32x128xbf16, #tpu.memory_space<vmem>>, vector<32x128xbf16>
    %cst_10 = arith.constant dense<0.000000e+00> : vector<8x128xf32>
    %12 = tpu.matmul %10, %11, %cst_10 {dimension_numbers = #tpu.dot_dimension_numbers<[1], [0], [0], [1], [0, 0, 1, 1], [], []>} : vector<8x32xbf16>, vector<32x128xbf16>, vector<8x128xf32> -> vector<8x128xf32>
    %c0_11 = arith.constant 0 : index
    %c0_12 = arith.constant 0 : index
    %13 = vector.load %arg5[%c0_11, %c0_12] : memref<8x128xf32, #tpu.memory_space<vmem>>, vector<8x128xf32>
    tpu.vector_store %arg5[%c0_11, %c0_12], %12 {strides = array<i32>} : memref<8x128xf32, #tpu.memory_space<vmem>>, vector<8x128xf32>,
    return
  }
  func.func @transform_0(%arg0: i32) -> (i32, i32) {
    %c0_i32 = arith.constant 0 : i32
    %c0_i32_0 = arith.constant 0 : i32
    return %arg0, %c0_i32 : i32, i32
  }
  func.func @transform_1(%arg0: i32) -> (i32, i32) {
    %c0_i32 = arith.constant 0 : i32
    %c0_i32_0 = arith.constant 0 : i32
    %c0_i32_1 = arith.constant 0 : i32
    return %c0_i32, %c0_i32_0 : i32, i32
  }
  func.func @transform_2(%arg0: i32) -> (i32, i32) {
    %c0_i32 = arith.constant 0 : i32
    %c0_i32_0 = arith.constant 0 : i32
    %c0_i32_1 = arith.constant 0 : i32
    return %c0_i32, %c0_i32_0 : i32, i32
  }
  func.func @transform_3(%arg0: i32) -> (i32, i32) {
    %c0_i32 = arith.constant 0 : i32
    %c0_i32_0 = arith.constant 0 : i32
    %c0_i32_1 = arith.constant 0 : i32
    return %c0_i32, %c0_i32_0 : i32, i32
  }
  func.func @transform_4(%arg0: i32) -> (i32, i32) {
    %c0_i32 = arith.constant 0 : i32
    %c0_i32_0 = arith.constant 0 : i32
    return %arg0, %c0_i32 : i32, i32
  }
}

</mosaic_0001>

<bundles_post_ra>
// kernel: fully_connected_forward.1
= control target key start
LH: loop header
LB: loop body
LE: loop exit
PB: predicated region body
PF: predicated region fallthrough
CT: control target
= control target key end

     0   :  { %vm27_vm0 = vcmask 130048   ;;  %vm62_vm1 = vcmask 261120   ;;  %s192_s1 = inlined_call_operand.vmem [shape: bf16[16,32], index: 1, kind: input, shape index: {}]   ;;  %s193_s0 = inlined_call_operand.vmem [shape: bf16[8,16], index: 0, kind: input, shape index: {}]   ;;  %s194_s2 = inlined_call_operand.vmem [shape: bf16[32,32], index: 2, kind: input, shape index: {}]   ;;  %s195_s3 = inlined_call_operand.vmem [shape: bf16[32,128], index: 3, kind: input, shape index: {}]   ;;  %s196_s4 = inlined_call_operand.vmem [shape: f32[8,128], index: 4, kind: output, shape index: {}]  }
   0x1   :  { %v141_v0 = vld [vmem:[%s192_s1] sm:$0xff]  ;;  %v143_v1 = vld [vmem:[%s194_s2 + $0x8] sm:$0xff] }
   0x2   :  { %38 = vmatpush.bf16.msra.mxu0 %v141_v0  ;;  %v18_v2 = vld [vmem:[%s193_s0] sm:$0xf]  ;;  %72 = vmatpush.bf16.msra.mxu1 %v143_v1  ;;  %v145_v4 = vld [vmem:[%s195_s3 + $0x8] sm:$0xff] }
   0x3   :  { %v142_v3 = vld [vmem:[%s194_s2] sm:$0xff]  ;;  %106 = vmatpush.bf16.msra.mxu2 %v145_v4 }
   0x4   :  { %v144_v9 = vld [vmem:[%s195_s3] sm:$0xff] }
   0x5   :  { %122 = vmatmul.msk.bf16.vlgmr.msra.gmra.mxu0 %vm27_vm0, %v18_v2 }
   0x6   :  { %73 = vmatpush.bf16.msra.mxu1 %v142_v3 }
   0x7   :  { %107 = vmatpush.bf16.msra.mxu2 %v144_v9 }
  0x82   :  { %v40_v5 = vpop.f32.mrf.mxu0 }
  0x83   :  { %v44_v6 = vmax.f32 %v40_v5, 0.0 }
  0x85   :  { %v45_v7 = vpack.c.bf16 %v44_v6, %v44_v6 }
  0x87   :  { %131 = vmatmul.msk.bf16.vlgmr.msra.gmra.mxu1 %vm62_vm1, %v45_v7 }
  0x8a   :  { %v42_v8 = vpop.f32.mrf.mxu0 }
 0x104   :  { %v75_v10 = vpop.f32.mrf.mxu1 }
 0x105   :  { %v79_v11 = vmax.f32 %v75_v10, 0.0 }
 0x107   :  { %v80_v12 = vpack.c.bf16 %v79_v11, %v79_v11 }
 0x109   :  { %140 = vmatmul.msk.bf16.vlgmr.msra.gmra.mxu2 %vm62_vm1, %v80_v12 }
 0x10c   :  { %v77_v13 = vpop.f32.mrf.mxu1 }
 0x18c   :  { %v109_v14 = vpop.f32.mrf.mxu2 }
 0x18d   :  { %113 = vst [vmem:[%s196_s4] sm:$0xff] %v109_v14 }
 0x194   :  { %v111_v15 = vpop.f32.mrf.mxu2 }

</bundles_post_ra>
